<compile_context>
chip_gen: v5e
topology: v5e:2x2
jax: 0.10.0
libtpu: 0.0.40
codegen_flags: <defaults>
</compile_context>

<pallas_src>
import functools

import jax
import jax.numpy as jnp
from jax import lax
from jax.experimental import pallas as pl
from jax.experimental.pallas import tpu as pltpu

LMAX = 2
SH_DIM = (LMAX + 1) ** 2  # 9
_EPS = 1e-12              # torch.nn.functional.normalize default eps

_SQRT3 = 3.0 ** 0.5
_SQRT5 = 5.0 ** 0.5
_SQRT15 = 15.0 ** 0.5


def _sh_kernel(vec_ref, sh_ref):
    """Sublane-packed, lane-dense SH evaluation.

    vec_ref: (3, R, 128) float32 VMEM tile (x/y/z slabs; 128 edges per lane row)
    sh_ref : (9, R, 128) float32 VMEM tile (one dense slab per SH component)
    """
    x = vec_ref[0]                       # (R, 128) dense tiles
    y = vec_ref[1]
    z = vec_ref[2]

    # normalize: rsqrt(max(|v|^2, eps^2)) -- one EUP op, no divide.
    n2 = x * x + y * y + z * z
    inv_r = lax.rsqrt(jnp.maximum(n2, _EPS * _EPS))
    x = x * inv_r
    y = y * inv_r
    z = z * inv_r

    x2 = x * x
    y2 = y * y
    z2 = z * z

    # e3nn 'component' normalization, e3nn m-ordering.
    # Direct per-component stores: unmasked, full-lane, no concat temp.
    sh_ref[0] = jnp.ones_like(x)                       # l = 0
    sh_ref[1] = _SQRT3 * x                             # l = 1
    sh_ref[2] = _SQRT3 * y
    sh_ref[3] = _SQRT3 * z
    sh_ref[4] = _SQRT15 * (x * z)                      # l = 2
    sh_ref[5] = _SQRT15 * (x * y)
    sh_ref[6] = _SQRT5 * (y2 - 0.5 * (x2 + z2))
    sh_ref[7] = _SQRT15 * (y * z)
    sh_ref[8] = (_SQRT15 / 2.0) * (z2 - x2)
    # TODO(synk): optional bf16 output (cast at the stores) would cut HBM write
    # traffic ~2x if the downstream tensor product tolerates it; kept f32 to match
    # the module's cast to torch.get_default_dtype().


@functools.partial(jax.jit, static_argnames=("tile_edges", "feature_major_output"))
def spherical_harmonic_edge_attrs(pos, edge_index, *, tile_edges=131072,
                                  feature_major_output=True):
    """Forward pass of SphericalHarmonicEdgeAttrs.

    pos        : (N, 3)  float positions
    edge_index : (2, E)  int32, edge_vec = pos[edge_index[1]] - pos[edge_index[0]]

    Returns {"edge_vectors": (E, 3) f32, "edge_attrs": (9, E) f32}.
    edge_attrs is feature-major (lane-dense) by default so no extra HBM transpose
    pass is spent; pass feature_major_output=False for the nequip (E, 9) layout.
    """
    # --- glue: with_edge_vectors_ (row gather on (N,3) + subtract; no cell shifts)
    # TODO(synk): PBC cell-shift term of with_edge_vectors_ not modeled (no cell input).
    # TODO(synk): the per-edge gather stays in XLA; fusing it into the kernel needs a
    # data-dependent per-element gather that BlockSpec/index_map cannot express.
    pos = pos.astype(jnp.float32)
    edge_vec = jnp.take(pos, edge_index[1], axis=0) - jnp.take(pos, edge_index[0], axis=0)
    e = edge_vec.shape[0]                                     # (E, 3)

    # --- pack edges: (E,3) -> (3, E_pad) -> (3, B, 128)  (reshape is free) -------
    e_pad = ((e + 127) // 128) * 128
    n_rows = e_pad // 128                                     # B sublane-packed rows
    vec_t = edge_vec.T                                        # (3, E) single relayout
    if e_pad != e:
        vec_t = jnp.pad(vec_t, ((0, 0), (0, e_pad - e)))
    vec_p = vec_t.reshape(3, n_rows, 128)

    # --- choose the per-step row tile R (multiple of 8, or full extent if tiny) --
    r_target = max(8, (int(tile_edges) // 128 // 8) * 8)      # ~tile_edges edges/step
    if n_rows <= 8:
        r_blk = n_rows                                        # single (possibly <8) block
    else:
        # keep >= ~8 grid steps when there is enough work (pipelining + v7x megacore)
        depth_cap = max(8, (n_rows // 8 // 8) * 8)
        r_blk = max(8, min(r_target, depth_cap))
    grid = (pl.cdiv(n_rows, r_blk),)    # ragged last block handled by Pallas

    sh_p = pl.pallas_call(
        _sh_kernel,
        out_shape=jax.ShapeDtypeStruct((SH_DIM, n_rows, 128), jnp.float32),
        grid_spec=pltpu.PrefetchScalarGridSpec(
            num_scalar_prefetch=0,
            grid=grid,
            in_specs=[pl.BlockSpec((3, r_blk, 128), lambda i: (0, i, 0))],
            out_specs=pl.BlockSpec((SH_DIM, r_blk, 128), lambda i: (0, i, 0)),
        ),
        compiler_params=pltpu.CompilerParams(
            dimension_semantics=("parallel",),        # shard edge-row tiles across TCs
            vmem_limit_bytes=48 * 1024 * 1024,        # headroom; default tile uses ~12 MiB
        ),
    )(vec_p)

    sh_t = sh_p.reshape(SH_DIM, e_pad)                # free reshape
    if e_pad != e:
        sh_t = sh_t[:, :e]
    edge_attrs = sh_t if feature_major_output else sh_t.T
    return {"edge_vectors": edge_vec, "edge_attrs": edge_attrs}


def _reference_sh(edge_vec):
    """Pure-JAX reference (torch F.normalize semantics), (E, 9) layout."""
    r = jnp.sqrt(jnp.sum(edge_vec * edge_vec, axis=-1, keepdims=True))
    u = edge_vec / jnp.maximum(r, _EPS)
    x, y, z = u[:, 0], u[:, 1], u[:, 2]
    return jnp.stack(
        [
            jnp.ones_like(x),
            _SQRT3 * x,
            _SQRT3 * y,
            _SQRT3 * z,
            _SQRT15 * x * z,
            _SQRT15 * x * y,
            _SQRT5 * (y * y - 0.5 * (x * x + z * z)),
            _SQRT15 * y * z,
            (_SQRT15 / 2.0) * (z * z - x * x),
        ],
        axis=-1,
    )


if __name__ == "__main__":
    key = jax.random.PRNGKey(0)
    k_pos, k_src, k_dst = jax.random.split(key, 3)

    n_atoms = 16
    n_edges = 40

    pos = jax.random.normal(k_pos, (n_atoms, 3), dtype=jnp.float32) * 2.0
    src = jax.random.randint(k_src, (n_edges,), 0, n_atoms, dtype=jnp.int32)
    dst = (src + 1 + jax.random.randint(k_dst, (n_edges,), 0, n_atoms - 1,
                                        dtype=jnp.int32)) % n_atoms   # avoid self-edges
    edge_index = jnp.stack([src, dst], axis=0)      # (2, E)

    # Default path: feature-major (9, E) output (no wrapper transpose pass).
    out = spherical_harmonic_edge_attrs(pos, edge_index)
    edge_sh = jax.block_until_ready(out["edge_attrs"])
    edge_vec = out["edge_vectors"]
    assert edge_sh.shape == (SH_DIM, n_edges)
    assert edge_sh.dtype == jnp.float32
    assert edge_vec.shape == (n_edges, 3)
    ref = _reference_sh(edge_vec)
    assert jnp.allclose(edge_sh.T, ref, atol=1e-4, rtol=1e-4)

    # nequip-convention (E, 9) layout path.
    out_eM = spherical_harmonic_edge_attrs(pos, edge_index, feature_major_output=False)
    edge_sh_eM = jax.block_until_ready(out_eM["edge_attrs"])
    assert edge_sh_eM.shape == (n_edges, SH_DIM)
    assert jnp.allclose(edge_sh_eM, ref, atol=1e-4, rtol=1e-4)

    # Golden m-ordering / sign check vs. e3nn component-normalized values for the
    # three axis unit vectors (locks in the e3nn convention independently of the
    # pure-JAX reference above).
    pos_g = jnp.array([[0., 0., 0.], [1., 0., 0.], [0., 1., 0.], [0., 0., 1.]],
                      dtype=jnp.float32)
    ei_g = jnp.array([[0, 0, 0], [1, 2, 3]], dtype=jnp.int32)   # edge_vec = ex, ey, ez
    got_g = spherical_harmonic_edge_attrs(pos_g, ei_g, feature_major_output=False)
    got_g = jax.block_until_ready(got_g["edge_attrs"])
    s3, s5, s15 = 3.0 ** 0.5, 5.0 ** 0.5, 15.0 ** 0.5
    want_g = jnp.array(
        [[1., s3, 0., 0., 0., 0., -s5 / 2., 0., -s15 / 2.],   # +x
         [1., 0., s3, 0., 0., 0.,  s5,      0.,  0.],         # +y
         [1., 0., 0., s3, 0., 0., -s5 / 2., 0.,  s15 / 2.]],  # +z
        dtype=jnp.float32)
    assert jnp.allclose(got_g, want_g, atol=1e-5, rtol=1e-5)

    # Exercise the multi-step grid + ragged last block path (B > R, B % R != 0).
    n_edges2 = 1500
    k_src2, k_dst2 = jax.random.split(k_dst)
    src2 = jax.random.randint(k_src2, (n_edges2,), 0, n_atoms, dtype=jnp.int32)
    dst2 = (src2 + 1 + jax.random.randint(k_dst2, (n_edges2,), 0, n_atoms - 1,
                                          dtype=jnp.int32)) % n_atoms
    edge_index2 = jnp.stack([src2, dst2], axis=0)
    out2 = spherical_harmonic_edge_attrs(pos, edge_index2, tile_edges=1024)
    edge_sh2 = jax.block_until_ready(out2["edge_attrs"])
    ref2 = _reference_sh(out2["edge_vectors"])
    assert edge_sh2.shape == (SH_DIM, n_edges2)
    assert jnp.allclose(edge_sh2.T, ref2, atol=1e-4, rtol=1e-4)

    print("KERNEL_OK")
</pallas_src>

<mosaic_0001>
module attributes {stable_mosaic.version = 11 : i64} {
  func.func @_sh_kernel(%arg0: i32, %arg1: memref<3x1x128xf32, #tpu.memory_space<vmem>>, %arg2: memref<9x1x128xf32, #tpu.memory_space<vmem>>) attributes {dimension_semantics = [#tpu.dimension_semantics<parallel>], iteration_bounds = array<i64: 1>, scalar_prefetch = 0 : i64, scratch_operands = 0 : i64, tpu.core_type = #tpu.core_type<tc>, window_params = [{transform_indices = @transform_0, window_bounds = array<i64: 3, 1, 128>}, {transform_indices = @transform_1, window_bounds = array<i64: 9, 1, 128>}]} {
    %c0 = arith.constant 0 : index
    %c0_0 = arith.constant 0 : index
    %c0_1 = arith.constant 0 : index
    %0 = vector.load %arg1[%c0, %c0_0, %c0_1] : memref<3x1x128xf32, #tpu.memory_space<vmem>>, vector<1x1x128xf32>
    %1 = vector.shape_cast %0 : vector<1x1x128xf32> to vector<1x128xf32>
    %c1 = arith.constant 1 : index
    %c0_2 = arith.constant 0 : index
    %c0_3 = arith.constant 0 : index
    %2 = vector.load %arg1[%c1, %c0_2, %c0_3] : memref<3x1x128xf32, #tpu.memory_space<vmem>>, vector<1x1x128xf32>
    %3 = vector.shape_cast %2 : vector<1x1x128xf32> to vector<1x128xf32>
    %c2 = arith.constant 2 : index
    %c0_4 = arith.constant 0 : index
    %c0_5 = arith.constant 0 : index
    %4 = vector.load %arg1[%c2, %c0_4, %c0_5] : memref<3x1x128xf32, #tpu.memory_space<vmem>>, vector<1x1x128xf32>
    %5 = vector.shape_cast %4 : vector<1x1x128xf32> to vector<1x128xf32>
    %6 = arith.mulf %1, %1 : vector<1x128xf32>
    %7 = arith.mulf %3, %3 : vector<1x128xf32>
    %8 = arith.addf %6, %7 : vector<1x128xf32>
    %9 = arith.mulf %5, %5 : vector<1x128xf32>
    %10 = arith.addf %8, %9 : vector<1x128xf32>
    %cst = arith.constant 1.000000e-24 : f32
    %11 = vector.broadcast %cst : f32 to vector<1x128xf32>
    %12 = arith.maximumf %10, %11 : vector<1x128xf32>
    %13 = math.rsqrt %12 : vector<1x128xf32>
    %14 = arith.mulf %1, %13 : vector<1x128xf32>
    %15 = arith.mulf %3, %13 : vector<1x128xf32>
    %16 = arith.mulf %5, %13 : vector<1x128xf32>
    %17 = arith.mulf %14, %14 : vector<1x128xf32>
    %18 = arith.mulf %15, %15 : vector<1x128xf32>
    %19 = arith.mulf %16, %16 : vector<1x128xf32>
    %cst_6 = arith.constant 1.000000e+00 : f32
    %20 = vector.broadcast %cst_6 : f32 to vector<1x128xf32>
    %c0_7 = arith.constant 0 : index
    %c0_8 = arith.constant 0 : index
    %c0_9 = arith.constant 0 : index
    %21 = vector.load %arg2[%c0_7, %c0_8, %c0_9] : memref<9x1x128xf32, #tpu.memory_space<vmem>>, vector<1x1x128xf32>
    %22 = vector.shape_cast %21 : vector<1x1x128xf32> to vector<1x128xf32>
    %23 = vector.shape_cast %20 : vector<1x128xf32> to vector<1x1x128xf32>
    tpu.vector_store %arg2[%c0_7, %c0_8, %c0_9], %23 {strides = array<i32>} : memref<9x1x128xf32, #tpu.memory_space<vmem>>, vector<1x1x128xf32>,
    %cst_10 = arith.constant 1.73205078 : f32
    %24 = vector.broadcast %cst_10 : f32 to vector<1x128xf32>
    %25 = arith.mulf %24, %14 : vector<1x128xf32>
    %c1_11 = arith.constant 1 : index
    %c0_12 = arith.constant 0 : index
    %c0_13 = arith.constant 0 : index
    %26 = vector.load %arg2[%c1_11, %c0_12, %c0_13] : memref<9x1x128xf32, #tpu.memory_space<vmem>>, vector<1x1x128xf32>
    %27 = vector.shape_cast %26 : vector<1x1x128xf32> to vector<1x128xf32>
    %28 = vector.shape_cast %25 : vector<1x128xf32> to vector<1x1x128xf32>
    tpu.vector_store %arg2[%c1_11, %c0_12, %c0_13], %28 {strides = array<i32>} : memref<9x1x128xf32, #tpu.memory_space<vmem>>, vector<1x1x128xf32>,
    %cst_14 = arith.constant 1.73205078 : f32
    %29 = vector.broadcast %cst_14 : f32 to vector<1x128xf32>
    %30 = arith.mulf %29, %15 : vector<1x128xf32>
    %c2_15 = arith.constant 2 : index
    %c0_16 = arith.constant 0 : index
    %c0_17 = arith.constant 0 : index
    %31 = vector.load %arg2[%c2_15, %c0_16, %c0_17] : memref<9x1x128xf32, #tpu.memory_space<vmem>>, vector<1x1x128xf32>
    %32 = vector.shape_cast %31 : vector<1x1x128xf32> to vector<1x128xf32>
    %33 = vector.shape_cast %30 : vector<1x128xf32> to vector<1x1x128xf32>
    tpu.vector_store %arg2[%c2_15, %c0_16, %c0_17], %33 {strides = array<i32>} : memref<9x1x128xf32, #tpu.memory_space<vmem>>, vector<1x1x128xf32>,
    %cst_18 = arith.constant 1.73205078 : f32
    %34 = vector.broadcast %cst_18 : f32 to vector<1x128xf32>
    %35 = arith.mulf %34, %16 : vector<1x128xf32>
    %c3 = arith.constant 3 : index
    %c0_19 = arith.constant 0 : index
    %c0_20 = arith.constant 0 : index
    %36 = vector.load %arg2[%c3, %c0_19, %c0_20] : memref<9x1x128xf32, #tpu.memory_space<vmem>>, vector<1x1x128xf32>
    %37 = vector.shape_cast %36 : vector<1x1x128xf32> to vector<1x128xf32>
    %38 = vector.shape_cast %35 : vector<1x128xf32> to vector<1x1x128xf32>
    tpu.vector_store %arg2[%c3, %c0_19, %c0_20], %38 {strides = array<i32>} : memref<9x1x128xf32, #tpu.memory_space<vmem>>, vector<1x1x128xf32>,
    %39 = arith.mulf %14, %16 : vector<1x128xf32>
    %cst_21 = arith.constant 3.87298346 : f32
    %40 = vector.broadcast %cst_21 : f32 to vector<1x128xf32>
    %41 = arith.mulf %40, %39 : vector<1x128xf32>
    %c4 = arith.constant 4 : index
    %c0_22 = arith.constant 0 : index
    %c0_23 = arith.constant 0 : index
    %42 = vector.load %arg2[%c4, %c0_22, %c0_23] : memref<9x1x128xf32, #tpu.memory_space<vmem>>, vector<1x1x128xf32>
    %43 = vector.shape_cast %42 : vector<1x1x128xf32> to vector<1x128xf32>
    %44 = vector.shape_cast %41 : vector<1x128xf32> to vector<1x1x128xf32>
    tpu.vector_store %arg2[%c4, %c0_22, %c0_23], %44 {strides = array<i32>} : memref<9x1x128xf32, #tpu.memory_space<vmem>>, vector<1x1x128xf32>,
    %45 = arith.mulf %14, %15 : vector<1x128xf32>
    %cst_24 = arith.constant 3.87298346 : f32
    %46 = vector.broadcast %cst_24 : f32 to vector<1x128xf32>
    %47 = arith.mulf %46, %45 : vector<1x128xf32>
    %c5 = arith.constant 5 : index
    %c0_25 = arith.constant 0 : index
    %c0_26 = arith.constant 0 : index
    %48 = vector.load %arg2[%c5, %c0_25, %c0_26] : memref<9x1x128xf32, #tpu.memory_space<vmem>>, vector<1x1x128xf32>
    %49 = vector.shape_cast %48 : vector<1x1x128xf32> to vector<1x128xf32>
    %50 = vector.shape_cast %47 : vector<1x128xf32> to vector<1x1x128xf32>
    tpu.vector_store %arg2[%c5, %c0_25, %c0_26], %50 {strides = array<i32>} : memref<9x1x128xf32, #tpu.memory_space<vmem>>, vector<1x1x128xf32>,
    %51 = arith.addf %17, %19 : vector<1x128xf32>
    %cst_27 = arith.constant 5.000000e-01 : f32
    %52 = vector.broadcast %cst_27 : f32 to vector<1x128xf32>
    %53 = arith.mulf %52, %51 : vector<1x128xf32>
    %54 = arith.subf %18, %53 : vector<1x128xf32>
    %cst_28 = arith.constant 2.23606801 : f32
    %55 = vector.broadcast %cst_28 : f32 to vector<1x128xf32>
    %56 = arith.mulf %55, %54 : vector<1x128xf32>
    %c6 = arith.constant 6 : index
    %c0_29 = arith.constant 0 : index
    %c0_30 = arith.constant 0 : index
    %57 = vector.load %arg2[%c6, %c0_29, %c0_30] : memref<9x1x128xf32, #tpu.memory_space<vmem>>, vector<1x1x128xf32>
    %58 = vector.shape_cast %57 : vector<1x1x128xf32> to vector<1x128xf32>
    %59 = vector.shape_cast %56 : vector<1x128xf32> to vector<1x1x128xf32>
    tpu.vector_store %arg2[%c6, %c0_29, %c0_30], %59 {strides = array<i32>} : memref<9x1x128xf32, #tpu.memory_space<vmem>>, vector<1x1x128xf32>,
    %60 = arith.mulf %15, %16 : vector<1x128xf32>
    %cst_31 = arith.constant 3.87298346 : f32
    %61 = vector.broadcast %cst_31 : f32 to vector<1x128xf32>
    %62 = arith.mulf %61, %60 : vector<1x128xf32>
    %c7 = arith.constant 7 : index
    %c0_32 = arith.constant 0 : index
    %c0_33 = arith.constant 0 : index
    %63 = vector.load %arg2[%c7, %c0_32, %c0_33] : memref<9x1x128xf32, #tpu.memory_space<vmem>>, vector<1x1x128xf32>
    %64 = vector.shape_cast %63 : vector<1x1x128xf32> to vector<1x128xf32>
    %65 = vector.shape_cast %62 : vector<1x128xf32> to vector<1x1x128xf32>
    tpu.vector_store %arg2[%c7, %c0_32, %c0_33], %65 {strides = array<i32>} : memref<9x1x128xf32, #tpu.memory_space<vmem>>, vector<1x1x128xf32>,
    %66 = arith.subf %19, %17 : vector<1x128xf32>
    %cst_34 = arith.constant 1.93649173 : f32
    %67 = vector.broadcast %cst_34 : f32 to vector<1x128xf32>
    %68 = arith.mulf %67, %66 : vector<1x128xf32>
    %c8 = arith.constant 8 : index
    %c0_35 = arith.constant 0 : index
    %c0_36 = arith.constant 0 : index
    %69 = vector.load %arg2[%c8, %c0_35, %c0_36] : memref<9x1x128xf32, #tpu.memory_space<vmem>>, vector<1x1x128xf32>
    %70 = vector.shape_cast %69 : vector<1x1x128xf32> to vector<1x128xf32>
    %71 = vector.shape_cast %68 : vector<1x128xf32> to vector<1x1x128xf32>
    tpu.vector_store %arg2[%c8, %c0_35, %c0_36], %71 {strides = array<i32>} : memref<9x1x128xf32, #tpu.memory_space<vmem>>, vector<1x1x128xf32>,
    return
  }
  func.func @transform_0(%arg0: i32) -> (i32, i32, i32) {
    %c0_i32 = arith.constant 0 : i32
    %c0_i32_0 = arith.constant 0 : i32
    %c0_i32_1 = arith.constant 0 : i32
    return %c0_i32, %arg0, %c0_i32_0 : i32, i32, i32
  }
  func.func @transform_1(%arg0: i32) -> (i32, i32, i32) {
    %c0_i32 = arith.constant 0 : i32
    %c0_i32_0 = arith.constant 0 : i32
    %c0_i32_1 = arith.constant 0 : i32
    return %c0_i32, %arg0, %c0_i32_0 : i32, i32, i32
  }
}

</mosaic_0001>

<bundles_post_ra>
// kernel: spherical_harmonic_edge_attrs.1
= control target key start
LH: loop header
LB: loop body
LE: loop exit
PB: predicated region body
PF: predicated region fallthrough
CT: control target
= control target key end

     0   :  { %v84_v0 = vmov 1.0   ;;  %s131_s1 = inlined_call_operand.vmem [shape: f32[9,1,128], index: 1, kind: output, shape index: {}]   ;;  %s132_s0 = inlined_call_operand.vmem [shape: f32[3,1,128], index: 0, kind: input, shape index: {}]  }
   0x1   :  { %35 = vst [vmem:[%s131_s1] sm:$0x1] %v84_v0  ;;  %v8_v1 = vld [vmem:[%s132_s0] sm:$0x1]  ;;  %v71_v2 = vld [vmem:[%s132_s0 + $0x1] sm:$0x1] }
   0x2   :  { %v72_v3 = vld [vmem:[%s132_s0 + $0x2] sm:$0x1]  ;;  %v13_v4 = vmul.f32 %v8_v1, %v8_v1  ;;  %v14_v5 = vmul.f32 %v71_v2, %v71_v2 }
   0x3   :  { %v16_v6 = vmul.f32 %v72_v3, %v72_v3 }
   0x4   :  { %v15_v7 = vadd.f32 %v14_v5, %v13_v4 }
   0x6   :  { %v17_v8 = vadd.f32 %v16_v6, %v15_v7 }
   0x8   :  { %v18_v9 = vmax.f32 %v17_v8, 1e-24 }
   0xa   :  { %82 = vrsqrt.f32 %v18_v9  ;;  %vm25_vm0 = vweird.f32 %v18_v9 }
  0x10   :  { %v83_v10 = vpop.eup %82 }
  0x11   :  { %v20_v11 = vmul.f32 %v83_v10, %v18_v9  ;;  %vm26_vm1 = vweird.f32 %v83_v10 }
  0x12   :  { %vm27_vm2 = vmor %vm25_vm0, %vm26_vm1 }
  0x13   :  { %v21_v12 = vmul.f32 %v83_v10, %v20_v11 }
  0x15   :  { %v22_v13 = vmul.f32 0.5, %v21_v12 }
  0x17   :  { %v23_v14 = vsub.f32 1.5, %v22_v13 }
  0x19   :  { %v24_v15 = vmul.f32 %v83_v10, %v23_v14 }
  0x1b   :  { %v28_v16 = vsel %vm27_vm2, %v83_v10, %v24_v15 }
  0x1c   :  { %v29_v17 = vmul.f32 %v28_v16, %v8_v1  ;;  %v30_v18 = vmul.f32 %v71_v2, %v28_v16  ;;  %v31_v19 = vmul.f32 %v72_v3, %v28_v16 }
  0x1e   :  { %v36_v20 = vmul.f32 1.7320508, %v29_v17  ;;  %v39_v21 = vmul.f32 1.7320508, %v30_v18  ;;  %v42_v22 = vmul.f32 1.7320508, %v31_v19  ;;  %v45_v23 = vmul.f32 %v31_v19, %v29_v17 }
  0x1f   :  { %v49_v24 = vmul.f32 %v30_v18, %v29_v17  ;;  %v32_v25 = vmul.f32 %v29_v17, %v29_v17  ;;  %v34_v26 = vmul.f32 %v31_v19, %v31_v19  ;;  %v59_v28 = vmul.f32 %v31_v19, %v30_v18 }
  0x20   :  { %73 = vst [vmem:[%s131_s1 + $0x1] sm:$0x1] %v36_v20  ;;  %v46_v27 = vmul.f32 3.8729835, %v45_v23  ;;  %v33_v30 = vmul.f32 %v30_v18, %v30_v18 }
  0x21   :  { %74 = vst [vmem:[%s131_s1 + $0x2] sm:$0x1] %v39_v21  ;;  %v50_v29 = vmul.f32 3.8729835, %v49_v24  ;;  %v53_v31 = vadd.f32 %v34_v26, %v32_v25  ;;  %v63_v32 = vsub.f32 %v34_v26, %v32_v25  ;;  %v60_v33 = vmul.f32 3.8729835, %v59_v28 }
  0x22   :  { %75 = vst [vmem:[%s131_s1 + $0x3] sm:$0x1] %v42_v22 }
  0x23   :  { %76 = vst [vmem:[%s131_s1 + $0x4] sm:$0x1] %v46_v27  ;;  %v54_v34 = vmul.f32 0.5, %v53_v31  ;;  %v64_v35 = vmul.f32 1.9364917, %v63_v32 }
  0x24   :  { %77 = vst [vmem:[%s131_s1 + $0x5] sm:$0x1] %v50_v29 }
  0x25   :  { %v55_v36 = vsub.f32 %v33_v30, %v54_v34  ;;  %79 = vst [vmem:[%s131_s1 + $0x7] sm:$0x1] %v60_v33 }
  0x26   :  { %80 = vst [vmem:[%s131_s1 + $0x8] sm:$0x1] %v64_v35 }
  0x27   :  { %v56_v37 = vmul.f32 2.236068, %v55_v36 }
  0x29   :  { %78 = vst [vmem:[%s131_s1 + $0x6] sm:$0x1] %v56_v37 }

</bundles_post_ra>
